<compile_context>
chip_gen: v7x
topology: tpu7x:2x2x1
jax: 0.10.0
libtpu: 0.0.40
codegen_flags: <defaults>
</compile_context>

<pallas_src>
import math
import functools

import jax
import jax.numpy as jnp
from jax.experimental import pallas as pl
from jax.experimental.pallas import tpu as pltpu


def _margin_head_kernel(x_ref, wn_ref, lbl_ref,                  # VMEM inputs
                        xn_ref, logits_ref, raw_ref, probs_ref,  # VMEM outputs
                        acc_ref,                                 # VMEM scratch (tb, D) f32
                        *, scale, cos_m, sin_m, theta, sinmm, inv_t):
    # Grid position read ONCE at kernel top level (never inside pl.when bodies).
    t = pl.program_id(1)
    nt = pl.num_programs(1)
    is_first = t == 0
    is_last = t == nt - 1

    # ---- streamed part: row-normalize the current (tb, tt, D) tile -----------
    x = x_ref[...].astype(jnp.float32)
    ss = jnp.sum(x * x, axis=-1, keepdims=True)
    # rsqrt(max(ss, 1e-24)) == 1 / max(||x||, 1e-12)  (matches F.normalize eps)
    inv_norm = jax.lax.rsqrt(jnp.maximum(ss, 1e-24))
    x_norm = x * inv_norm
    xn_ref[...] = x_norm.astype(xn_ref.dtype)

    @pl.when(is_first)
    def _init():
        acc_ref[...] = jnp.zeros_like(acc_ref)

    # Running sum over the T axis (the mean commutes with the linear matmul).
    acc_ref[...] += jnp.sum(x_norm, axis=1)                      # (tb, D)

    # ---- tail: once per B tile, on the last T step ----------------------------
    @pl.when(is_last)
    def _finalize():
        x_mean = acc_ref[...] * inv_t                            # (tb, D) mean over T
        logits = jnp.dot(x_mean.astype(wn_ref.dtype), wn_ref[...],
                         preferred_element_type=jnp.float32)     # (tb, D) @ (D, C)

        raw = logits * scale
        raw_ref[...] = raw.astype(raw_ref.dtype)

        m = jnp.max(raw, axis=-1, keepdims=True)
        e = jnp.exp(raw - m)
        probs_ref[...] = (e / jnp.sum(e, axis=-1, keepdims=True)).astype(probs_ref.dtype)

        # ArcFace margin at (row, labels[row]) for rows whose label != -1:
        # one broadcast compare against the (tb, 1) label column.
        lbl = lbl_ref[...]                                       # (tb, 1) int32
        col_ids = jax.lax.broadcasted_iota(jnp.int32, logits.shape, 1)
        tgt_mask = (lbl != -1) & (col_ids == lbl)

        sin_theta = jnp.sqrt(jnp.maximum(1.0 - logits * logits, 0.0))
        cos_theta_m = logits * cos_m - sin_theta * sin_m
        arc = jnp.where(logits > theta, cos_theta_m, logits - sinmm)
        logits_ref[...] = (jnp.where(tgt_mask, arc, logits) * scale).astype(logits_ref.dtype)


def _vmem_capacity_bytes():
    """Device VMEM capacity, with a conservative (v7x-sized) fallback."""
    try:
        info = pltpu.get_tpu_info()
        return int(getattr(info, "vmem_capacity_bytes", 64 * 1024 * 1024))
    except Exception:
        return 64 * 1024 * 1024


def _choose_tiles(B, T, D, C, x_bpe, xn_bpe, w_bpe, block_b, block_t, vmem_cap):
    # Batch tile: large enough to feed the MXU tail matmul efficiently, but
    # aim for >= 2 B-tiles when possible so the 'parallel' B axis can shard
    # across cores (v7x has two TensorCores).
    if B > block_b:
        tb = block_b                          # block_b is a multiple of 8
    else:
        tb = B
        half = ((B // 2) // 8) * 8
        if half >= 8:
            tb = half
    nb = -(-B // tb)

    # Time tile: largest multiple of 8 that keeps the double-buffered x/xn
    # stream + resident weight + (tb, C) tail blocks under the VMEM budget.
    budget = int(vmem_cap * 0.75)
    fixed = (D * C * w_bpe * 2                # Wn^T (conservatively 2 buffers)
             + 3 * tb * C * 4 * 2             # logits/raw/probs blocks (f32, 2 bufs)
             + tb * 4 * 2                     # label column
             + tb * D * 4)                    # f32 accumulator scratch
    row_bytes = tb * D * (x_bpe + xn_bpe)     # one T-row of x + xn, one buffer
    per_buf_cap = 8 * 2**20 if vmem_cap >= 96 * 2**20 else 4 * 2**20
    tt_budget = max((budget - fixed) // (2 * row_bytes), 1)
    tt_cap = max(per_buf_cap // max(tb * D * x_bpe, 1), 1)
    tt = max(min(block_t, T, tt_budget, tt_cap), 1)
    if tt < T:
        tt = max((tt // 8) * 8, 8)
        if tt >= T:
            tt = T
    nt = -(-T // tt)
    return tb, nb, tt, nt


def margin_visual_head(x, labels, weight, *, scale=64.0, margin=0.5,
                       block_b=128, block_t=256,
                       feature_norm_dtype=None, weight_dtype=None):
    """JAX/Pallas equivalent of MarginVisualHead.forward (3-D input path,
    mean_first=False, variant='arcface')."""
    B, T, D = x.shape
    C = weight.shape[0]
    cos_m = math.cos(margin)
    sin_m = math.sin(margin)
    theta = math.cos(math.pi - margin)
    sinmm = math.sin(math.pi - margin) * margin

    xn_dtype = jnp.dtype(feature_norm_dtype) if feature_norm_dtype is not None else x.dtype
    w_dtype = jnp.dtype(weight_dtype) if weight_dtype is not None else x.dtype

    vmem_cap = _vmem_capacity_bytes()
    tb, nb, tt, nt = _choose_tiles(
        B, T, D, C,
        jnp.dtype(x.dtype).itemsize, jnp.dtype(xn_dtype).itemsize,
        jnp.dtype(w_dtype).itemsize, block_b, block_t, vmem_cap)
    Bp, Tp = nb * tb, nt * tt

    # Normalize + transpose the classifier weight ONCE in the wrapper: the
    # (D, C) Wn^T feeds the MXU lane-contiguously and stays resident in VMEM.
    w32 = weight.astype(jnp.float32)
    w_inv = jax.lax.rsqrt(jnp.maximum(jnp.sum(w32 * w32, axis=-1, keepdims=True), 1e-24))
    w_norm_t = jnp.transpose(w32 * w_inv).astype(w_dtype)

    labels_col = labels.astype(jnp.int32).reshape(B, 1)
    x_in = x
    if (Bp, Tp) != (B, T):
        # Pad to the tile grid: zero feature rows normalize to zero (no effect
        # on the sum) and padded labels are -1 (no margin applied); outputs
        # are sliced back below. inv_t stays 1/T_real.
        x_in = jnp.pad(x, ((0, Bp - B), (0, Tp - T), (0, 0)))
        labels_col = jnp.pad(labels_col, ((0, Bp - B), (0, 0)), constant_values=-1)

    kernel = functools.partial(
        _margin_head_kernel,
        scale=float(scale), cos_m=cos_m, sin_m=sin_m, theta=theta, sinmm=sinmm,
        inv_t=1.0 / float(T))

    # The weight's index_map is constant -> single-buffer it when supported so
    # it does not cost 2x VMEM (important on v7x's 64 MiB per TC).
    try:
        w_spec = pl.BlockSpec((D, C), lambda b, t: (0, 0),
                              pipeline_mode=pl.Buffered(1))
    except Exception:
        w_spec = pl.BlockSpec((D, C), lambda b, t: (0, 0))

    out_shapes = (
        jax.ShapeDtypeStruct((Bp, Tp, D), xn_dtype),     # gloss_feature_norm
        jax.ShapeDtypeStruct((Bp, C), jnp.float32),      # gloss_logits (margin * scale)
        jax.ShapeDtypeStruct((Bp, C), jnp.float32),      # gloss_raw_logits
        jax.ShapeDtypeStruct((Bp, C), jnp.float32),      # gloss_probabilities
    )

    xn, logits, raw, probs = pl.pallas_call(
        kernel,
        out_shape=out_shapes,
        grid=(nb, nt),
        in_specs=[
            pl.BlockSpec((tb, tt, D), lambda b, t: (b, t, 0)),   # x streams
            w_spec,                                              # Wn^T resident
            pl.BlockSpec((tb, 1), lambda b, t: (b, 0)),          # label column
        ],
        out_specs=(
            pl.BlockSpec((tb, tt, D), lambda b, t: (b, t, 0)),   # xn streams
            pl.BlockSpec((tb, C), lambda b, t: (b, 0)),          # resident over T
            pl.BlockSpec((tb, C), lambda b, t: (b, 0)),
            pl.BlockSpec((tb, C), lambda b, t: (b, 0)),
        ),
        scratch_shapes=[pltpu.VMEM((tb, D), jnp.float32)],       # sum_t accumulator
        compiler_params=pltpu.CompilerParams(
            dimension_semantics=("parallel", "arbitrary"),
            vmem_limit_bytes=int(vmem_cap * 0.85)),
    )(x_in, w_norm_t, labels_col)

    if (Bp, Tp) != (B, T):
        xn = xn[:B, :T]
        logits, raw, probs = logits[:B], raw[:B], probs[:B]

    return {
        'gloss_feature': x,
        'gloss_feature_norm': xn,
        'fea_vect': None,
        'gloss_logits': logits,
        'gloss_raw_logits': raw,
        'gloss_probabilities': probs,
        'word_emb_att_scores': None,
    }


def _reference(x, labels, weight, scale=64.0, margin=0.5):
    """Pure-JAX mirror of the torch forward for verification."""
    cos_m, sin_m = math.cos(margin), math.sin(margin)
    theta = math.cos(math.pi - margin)
    sinmm = math.sin(math.pi - margin) * margin
    xn = x / jnp.maximum(jnp.linalg.norm(x, axis=-1, keepdims=True), 1e-12)
    wn = weight / jnp.maximum(jnp.linalg.norm(weight, axis=-1, keepdims=True), 1e-12)
    logits = jnp.einsum('btd,cd->btc', xn, wn).mean(axis=1)          # (B, C)
    raw = logits * scale
    col = jnp.arange(logits.shape[1])[None, :]
    mask = (labels[:, None] != -1) & (col == labels[:, None])
    sin_t = jnp.sqrt(jnp.maximum(1.0 - logits ** 2, 0.0))
    arc = jnp.where(logits > theta, logits * cos_m - sin_t * sin_m, logits - sinmm)
    out = jnp.where(mask, arc, logits) * scale
    probs = jax.nn.softmax(raw, axis=-1)
    return xn, out, raw, probs


if __name__ == "__main__":
    B, T, D, C = 2, 16, 32, 16
    key = jax.random.PRNGKey(0)
    kx, kw = jax.random.split(key, 2)

    x = jax.random.normal(kx, (B, T, D), dtype=jnp.float32)
    # torch.normal(0, 0.01, (cls_num, input_size))
    weight = 0.01 * jax.random.normal(kw, (C, D), dtype=jnp.float32)
    # one valid label, one ignored (-1), deterministic
    labels = jnp.array([3, -1], dtype=jnp.int32)

    # block_t=8 -> 2-step T reduction so the accumulator path is exercised.
    out = margin_visual_head(x, labels, weight, scale=64.0, margin=0.5,
                             block_b=128, block_t=8)
    jax.block_until_ready(out['gloss_logits'])

    xn_r, logits_r, raw_r, probs_r = _reference(x, labels, weight)
    assert jnp.allclose(out['gloss_feature_norm'], xn_r, atol=1e-4, rtol=1e-4)
    assert jnp.allclose(out['gloss_raw_logits'], raw_r, atol=1e-3, rtol=1e-4)
    assert jnp.allclose(out['gloss_logits'], logits_r, atol=1e-3, rtol=1e-4)
    assert jnp.allclose(out['gloss_probabilities'], probs_r, atol=1e-3, rtol=1e-3)

    print("KERNEL_OK")
</pallas_src>

<mosaic_0001>
module attributes {stable_mosaic.version = 11 : i64} {
  func.func @_margin_head_kernel(%arg0: i32, %arg1: i32, %arg2: memref<2x8x32xf32, #tpu.memory_space<vmem>>, %arg3: memref<32x16xf32, #tpu.memory_space<vmem>>, %arg4: memref<2x1xi32, #tpu.memory_space<vmem>>, %arg5: memref<2x8x32xf32, #tpu.memory_space<vmem>>, %arg6: memref<2x16xf32, #tpu.memory_space<vmem>>, %arg7: memref<2x16xf32, #tpu.memory_space<vmem>>, %arg8: memref<2x16xf32, #tpu.memory_space<vmem>>, %arg9: memref<2x32xf32, #tpu.memory_space<vmem>>) attributes {dimension_semantics = [#tpu.dimension_semantics<parallel>, #tpu.dimension_semantics<arbitrary>], iteration_bounds = array<i64: 1, 2>, scalar_prefetch = 0 : i64, scratch_operands = 1 : i64, tpu.core_type = #tpu.core_type<tc>, window_params = [{transform_indices = @transform_0, window_bounds = array<i64: 2, 8, 32>}, {pipeline_mode = #tpu.pipeline_mode<synchronous>, transform_indices = @transform_1, window_bounds = array<i64: 32, 16>}, {transform_indices = @transform_2, window_bounds = array<i64: 2, 1>}, {transform_indices = @transform_3, window_bounds = array<i64: 2, 8, 32>}, {transform_indices = @transform_4, window_bounds = array<i64: 2, 16>}, {transform_indices = @transform_5, window_bounds = array<i64: 2, 16>}, {transform_indices = @transform_6, window_bounds = array<i64: 2, 16>}]} {
    %c0_i32 = arith.constant 0 : i32
    %0 = arith.cmpi eq, %arg1, %c0_i32 : i32
    %c1_i32 = arith.constant 1 : i32
    %1 = arith.cmpi eq, %arg1, %c1_i32 : i32
    %c0 = arith.constant 0 : index
    %c0_0 = arith.constant 0 : index
    %c0_1 = arith.constant 0 : index
    %2 = vector.load %arg2[%c0, %c0_0, %c0_1] : memref<2x8x32xf32, #tpu.memory_space<vmem>>, vector<2x8x32xf32>
    %3 = arith.mulf %2, %2 : vector<2x8x32xf32>
    %cst = arith.constant dense<0.000000e+00> : vector<2x8xf32>
    %4 = vector.multi_reduction <add>, %3, %cst [2] : vector<2x8x32xf32> to vector<2x8xf32>
    %5 = vector.shape_cast %4 : vector<2x8xf32> to vector<2x8x1xf32>
    %cst_2 = arith.constant 1.000000e-24 : f32
    %6 = vector.broadcast %cst_2 : f32 to vector<2x8x1xf32>
    %7 = arith.maximumf %5, %6 : vector<2x8x1xf32>
    %8 = math.rsqrt %7 : vector<2x8x1xf32>
    %9 = vector.broadcast %8 : vector<2x8x1xf32> to vector<2x8x32xf32>
    %10 = arith.mulf %2, %9 : vector<2x8x32xf32>
    %c0_3 = arith.constant 0 : index
    %c0_4 = arith.constant 0 : index
    %c0_5 = arith.constant 0 : index
    %11 = vector.load %arg5[%c0_3, %c0_4, %c0_5] : memref<2x8x32xf32, #tpu.memory_space<vmem>>, vector<2x8x32xf32>
    tpu.vector_store %arg5[%c0_3, %c0_4, %c0_5], %10 {strides = array<i32>} : memref<2x8x32xf32, #tpu.memory_space<vmem>>, vector<2x8x32xf32>,
    %12 = arith.extui %0 : i1 to i32
    %c0_i32_6 = arith.constant 0 : i32
    %13 = arith.cmpi ne, %12, %c0_i32_6 : i32
    scf.if %13 {
      %cst_13 = arith.constant 0.000000e+00 : f32
      %20 = vector.broadcast %cst_13 : f32 to vector<2x32xf32>
      %c0_14 = arith.constant 0 : index
      %c0_15 = arith.constant 0 : index
      %21 = vector.load %arg9[%c0_14, %c0_15] : memref<2x32xf32, #tpu.memory_space<vmem>>, vector<2x32xf32>
      tpu.vector_store %arg9[%c0_14, %c0_15], %20 {strides = array<i32>} : memref<2x32xf32, #tpu.memory_space<vmem>>, vector<2x32xf32>,
    } else {
    }
    %c0_7 = arith.constant 0 : index
    %c0_8 = arith.constant 0 : index
    %14 = vector.load %arg9[%c0_7, %c0_8] : memref<2x32xf32, #tpu.memory_space<vmem>>, vector<2x32xf32>
    %cst_9 = arith.constant dense<0.000000e+00> : vector<2x32xf32>
    %15 = vector.multi_reduction <add>, %10, %cst_9 [1] : vector<2x8x32xf32> to vector<2x32xf32>
    %16 = arith.addf %14, %15 : vector<2x32xf32>
    %c0_10 = arith.constant 0 : index
    %c0_11 = arith.constant 0 : index
    %17 = vector.load %arg9[%c0_10, %c0_11] : memref<2x32xf32, #tpu.memory_space<vmem>>, vector<2x32xf32>
    tpu.vector_store %arg9[%c0_10, %c0_11], %16 {strides = array<i32>} : memref<2x32xf32, #tpu.memory_space<vmem>>, vector<2x32xf32>,
    %18 = arith.extui %1 : i1 to i32
    %c0_i32_12 = arith.constant 0 : i32
    %19 = arith.cmpi ne, %18, %c0_i32_12 : i32
    scf.if %19 {
      %c0_13 = arith.constant 0 : index
      %c0_14 = arith.constant 0 : index
      %20 = vector.load %arg9[%c0_13, %c0_14] : memref<2x32xf32, #tpu.memory_space<vmem>>, vector<2x32xf32>
      %cst_15 = arith.constant 6.250000e-02 : f32
      %21 = vector.broadcast %cst_15 : f32 to vector<2x32xf32>
      %22 = arith.mulf %20, %21 : vector<2x32xf32>
      %c0_16 = arith.constant 0 : index
      %c0_17 = arith.constant 0 : index
      %23 = vector.load %arg3[%c0_16, %c0_17] : memref<32x16xf32, #tpu.memory_space<vmem>>, vector<32x16xf32>
      %cst_18 = arith.constant dense<0.000000e+00> : vector<2x16xf32>
      %24 = tpu.matmul %22, %23, %cst_18 {dimension_numbers = #tpu.dot_dimension_numbers<[1], [0], [0], [1], [0, 0, 1, 1], [], []>} : vector<2x32xf32>, vector<32x16xf32>, vector<2x16xf32> -> vector<2x16xf32>
      %cst_19 = arith.constant 6.400000e+01 : f32
      %25 = vector.broadcast %cst_19 : f32 to vector<2x16xf32>
      %26 = arith.mulf %24, %25 : vector<2x16xf32>
      %c0_20 = arith.constant 0 : index
      %c0_21 = arith.constant 0 : index
      %27 = vector.load %arg7[%c0_20, %c0_21] : memref<2x16xf32, #tpu.memory_space<vmem>>, vector<2x16xf32>
      tpu.vector_store %arg7[%c0_20, %c0_21], %26 {strides = array<i32>} : memref<2x16xf32, #tpu.memory_space<vmem>>, vector<2x16xf32>,
      %cst_22 = arith.constant dense<0xFF800000> : vector<2xf32>
      %28 = vector.multi_reduction <maximumf>, %26, %cst_22 [1] : vector<2x16xf32> to vector<2xf32>
      %29 = vector.shape_cast %28 : vector<2xf32> to vector<2x1xf32>
      %30 = vector.broadcast %29 : vector<2x1xf32> to vector<2x16xf32>
      %31 = arith.subf %26, %30 : vector<2x16xf32>
      %32 = math.exp %31 : vector<2x16xf32>
      %cst_23 = arith.constant dense<0.000000e+00> : vector<2xf32>
      %33 = vector.multi_reduction <add>, %32, %cst_23 [1] : vector<2x16xf32> to vector<2xf32>
      %34 = vector.shape_cast %33 : vector<2xf32> to vector<2x1xf32>
      %35 = vector.broadcast %34 : vector<2x1xf32> to vector<2x16xf32>
      %36 = arith.divf %32, %35 : vector<2x16xf32>
      %c0_24 = arith.constant 0 : index
      %c0_25 = arith.constant 0 : index
      %37 = vector.load %arg8[%c0_24, %c0_25] : memref<2x16xf32, #tpu.memory_space<vmem>>, vector<2x16xf32>
      tpu.vector_store %arg8[%c0_24, %c0_25], %36 {strides = array<i32>} : memref<2x16xf32, #tpu.memory_space<vmem>>, vector<2x16xf32>,
      %c0_26 = arith.constant 0 : index
      %c0_27 = arith.constant 0 : index
      %38 = vector.load %arg4[%c0_26, %c0_27] : memref<2x1xi32, #tpu.memory_space<vmem>>, vector<2x1xi32>
      %39 = tpu.iota {dimensions = array<i32: 1>} : vector<2x16xi32>
      %c-1_i32 = arith.constant -1 : i32
      %40 = vector.broadcast %c-1_i32 : i32 to vector<2x1xi32>
      %41 = arith.cmpi ne, %38, %40 : vector<2x1xi32>
      %42 = vector.broadcast %38 : vector<2x1xi32> to vector<2x16xi32>
      %43 = arith.cmpi eq, %39, %42 : vector<2x16xi32>
      %44 = vector.broadcast %41 : vector<2x1xi1> to vector<2x16xi1>
      %45 = arith.andi %44, %43 : vector<2x16xi1>
      %46 = arith.mulf %24, %24 : vector<2x16xf32>
      %cst_28 = arith.constant 1.000000e+00 : f32
      %47 = vector.broadcast %cst_28 : f32 to vector<2x16xf32>
      %48 = arith.subf %47, %46 : vector<2x16xf32>
      %cst_29 = arith.constant 0.000000e+00 : f32
      %49 = vector.broadcast %cst_29 : f32 to vector<2x16xf32>
      %50 = arith.maximumf %48, %49 : vector<2x16xf32>
      %51 = math.sqrt %50 : vector<2x16xf32>
      %cst_30 = arith.constant 0.87758255 : f32
      %52 = vector.broadcast %cst_30 : f32 to vector<2x16xf32>
      %53 = arith.mulf %24, %52 : vector<2x16xf32>
      %cst_31 = arith.constant 0.47942555 : f32
      %54 = vector.broadcast %cst_31 : f32 to vector<2x16xf32>
      %55 = arith.mulf %51, %54 : vector<2x16xf32>
      %56 = arith.subf %53, %55 : vector<2x16xf32>
      %cst_32 = arith.constant -0.87758255 : f32
      %57 = vector.broadcast %cst_32 : f32 to vector<2x16xf32>
      %58 = arith.cmpf ogt, %24, %57 : vector<2x16xf32>
      %cst_33 = arith.constant 0.239712775 : f32
      %59 = vector.broadcast %cst_33 : f32 to vector<2x16xf32>
      %60 = arith.subf %24, %59 : vector<2x16xf32>
      %61 = arith.select %58, %56, %60 : vector<2x16xi1>, vector<2x16xf32>
      %62 = arith.select %45, %61, %24 : vector<2x16xi1>, vector<2x16xf32>
      %cst_34 = arith.constant 6.400000e+01 : f32
      %63 = vector.broadcast %cst_34 : f32 to vector<2x16xf32>
      %64 = arith.mulf %62, %63 : vector<2x16xf32>
      %c0_35 = arith.constant 0 : index
      %c0_36 = arith.constant 0 : index
      %65 = vector.load %arg6[%c0_35, %c0_36] : memref<2x16xf32, #tpu.memory_space<vmem>>, vector<2x16xf32>
      tpu.vector_store %arg6[%c0_35, %c0_36], %64 {strides = array<i32>} : memref<2x16xf32, #tpu.memory_space<vmem>>, vector<2x16xf32>,
    } else {
    }
    return
  }
  func.func @transform_0(%arg0: i32, %arg1: i32) -> (i32, i32, i32) {
    %c0_i32 = arith.constant 0 : i32
    %c0_i32_0 = arith.constant 0 : i32
    return %arg0, %arg1, %c0_i32 : i32, i32, i32
  }
  func.func @transform_1(%arg0: i32, %arg1: i32) -> (i32, i32) {
    %c0_i32 = arith.constant 0 : i32
    %c0_i32_0 = arith.constant 0 : i32
    %c0_i32_1 = arith.constant 0 : i32
    return %c0_i32, %c0_i32_0 : i32, i32
  }
  func.func @transform_2(%arg0: i32, %arg1: i32) -> (i32, i32) {
    %c0_i32 = arith.constant 0 : i32
    %c0_i32_0 = arith.constant 0 : i32
    return %arg0, %c0_i32 : i32, i32
  }
  func.func @transform_3(%arg0: i32, %arg1: i32) -> (i32, i32, i32) {
    %c0_i32 = arith.constant 0 : i32
    %c0_i32_0 = arith.constant 0 : i32
    return %arg0, %arg1, %c0_i32 : i32, i32, i32
  }
  func.func @transform_4(%arg0: i32, %arg1: i32) -> (i32, i32) {
    %c0_i32 = arith.constant 0 : i32
    %c0_i32_0 = arith.constant 0 : i32
    return %arg0, %c0_i32 : i32, i32
  }
  func.func @transform_5(%arg0: i32, %arg1: i32) -> (i32, i32) {
    %c0_i32 = arith.constant 0 : i32
    %c0_i32_0 = arith.constant 0 : i32
    return %arg0, %c0_i32 : i32, i32
  }
  func.func @transform_6(%arg0: i32, %arg1: i32) -> (i32, i32) {
    %c0_i32 = arith.constant 0 : i32
    %c0_i32_0 = arith.constant 0 : i32
    return %arg0, %c0_i32 : i32, i32
  }
}

</mosaic_0001>

<bundles_post_ra>
// kernel: tpu_custom_call.1
= control target key start
LH: loop header
LB: loop body
LE: loop exit
PB: predicated region body
PF: predicated region fallthrough
CT: control target
= control target key end

     0   :  { %12 = vsyncpa [#allocation5], 0  ;;  %s1290_s0 = inlined_call_operand.vmem [shape: f32[2,16,32], index: 0, kind: input, shape index: {}]   ;;  %s1291_s1 = inlined_call_operand.vmem [shape: f32[32,16], index: 1, kind: input, shape index: {}]   ;;  %s1292_s2 = inlined_call_operand.vmem [shape: s32[2,1], index: 2, kind: input, shape index: {}]   ;;  %s1293_s3 = inlined_call_operand.hbm [shape: f32[2,16,32], index: 3, kind: output, shape index: {0}]   ;;  %s1294_s4 = inlined_call_operand.hbm [shape: f32[2,16], index: 4, kind: output, shape index: {1}]   ;;  %s1295_s5 = inlined_call_operand.hbm [shape: f32[2,16], index: 5, kind: output, shape index: {2}]   ;;  %s1296_s6 = inlined_call_operand.hbm [shape: f32[2,16], index: 6, kind: output, shape index: {3}]  }
   0x1   :  { %14 = vsyncpa [#allocation5 + $0x1], 0 }
   0x2   :  { %15 = vsyncpa [#allocation7], 0 }
   0x3   :  { %16 = vsyncpa [#allocation10], 0  ;;  %s1057_s21 = smov 0   ;;  %s1059_s22 = smov 0  }
   0x4   :  { %s1061_s23 = smov 0   ;;  %s1063_s24 = smov 0  }
   0x5   :  { %s1065_s25 = smov 0   ;;  %s1067_s26 = smov 0  }
   0x6 LB: > { %s702_s27 = sadd.s32 4294967295, %s1008_s26   ;;  %s703_s28 = sadd.s32 4294967294, %s1008_s26   ;;  %s1008_s26 = sphi %s1067_s26, %s22_s26   ;;  %s1004_s25 = sphi %s1065_s25, %s1304_s25   ;;  %s1000_s24 = sphi %s1063_s24, %s1303_s24   ;;  %s996_s23 = sphi %s1061_s23, %s1302_s23   ;;  %s992_s22 = sphi %s1059_s22, %s1301_s22   ;;  %s988_s21 = sphi %s1057_s21, %s1300_s21  }
   0x7   : > { %s31_s29 = sadd.s32 1, %s1004_s25  ;;  %s43_s30 = sadd.s32 1, %s996_s23 }
   0x8   : > { %p32_p0 = scmp.ge.s32.totalorder %s31_s29, 2  ;;  %p50_p1 = scmp.ne.s32.totalorder %s996_s23, %s992_s22 }
   0x9   : > { %p51_p2 = scmp.eq.s32.totalorder %s1008_s26, 0  ;;  %p1094_p3 = scmp.eq.s32.totalorder %s702_s27, 1 }
   0xa   : > { %s1306_s29 = smov (%p32_p0, %s31_s29), 0  ;;  %p134_p6 = scmp.ne.s32.totalorder %s992_s22, %s988_s21 }
   0xb   : > { %p52_p4 = por %p51_p2, %p50_p1  ;;  %p1102_p5 = por %p1094_p3, %p50_p1 }
   0xc   : > { %s39_s9 = ssub.s32 %s1004_s25, %s1306_s29  ;;  %p135_p8 = scmp.eq.s32.totalorder %s703_s28, 1 }
   0xd   : > { %p41_p7 = scmp.eq.s32.totalorder %s39_s9, 0  ;;  %p706_p10 = scmp.ge.s32.totalorder %s1008_s26, 2 }
   0xe   : > { %p1113_p9 = por %p135_p8, %p134_p6 }
   0xf   : > { %s1111_s10 = scalar_select %p41_p7, %s996_s23, %s43_s30  }
  0x10   : > { %239 = sbr.rel (%p706_p10) target bundleno = 30 (0x1e), region = 24 }
  0x17   : > { %242 = sbr.rel (!%p52_p4) target bundleno = 30 (0x1e), region = 28  ;;  %s244_s12 = sand.u32 (%p52_p4), 1, %s996_s23  }
  0x18   : > { %s708_s13 = sshll.u32 (%p52_p4), %s1004_s25, 3  ;;  %s707_s14 = sshll.u32 (%p52_p4), %s244_s12, 4 }
  0x19   : > { %s251_s17 = scalar_lea.vmem (%p52_p4), %s1290_s0, %s708_s13  ;;  %s246_s18 = scalar_lea.vmem (%p52_p4), [#allocation3], %s707_s14 }
  0x1a   : > { %v281_v0 = vld [vmem:[%s251_s17] sm:$0xff] (%p52_p4)  ;;  %v283_v1 = vld [vmem:[%s251_s17 + $0x10] sm:$0xff] (%p52_p4) }
  0x1b   : > { %282 = vst [vmem:[%s246_s18] sm:$0xff] (%p52_p4), %v281_v0  ;;  %284 = vst [vmem:[%s246_s18 + $0x8] sm:$0xff] (%p52_p4), %v283_v1 }
  0x1e PF: > { %p709_p11 = scmp.ge.s32.totalorder %s1008_s26, 1  ;;  %p289_p12 = scmp.lt.s32.totalorder %s1008_s26, 3 }
  0x20   : > { %p290_p13 = pnand %p709_p11, %p289_p12 }
  0x21   : > { %s296_s19 = sand.u32 (!%p290_p13), 1, %s992_s22   ;;  %vm341_vm0 = vcmask (!%p290_p13), 261120   ;;  %p712_p0 = scmp.ne.s32.totalorder (!%p290_p13), %s1000_s24, 0 }
  0x22   : > { %293 = sbr.rel (%p290_p13) target bundleno = 853 (0x355), region = 66  ;;  %s710_s20 = sshll.u32 (!%p290_p13), %s296_s19, 4 }
  0x23   : > { %s298_s27 = scalar_lea.vmem (!%p290_p13), [#allocation3], %s710_s20  ;;  %s1132_s28 = scalar_lea.vmem (!%p290_p13), [#allocation4], %s710_s20 }
  0x24   : > { %v337_v2 = vld [vmem:[%s298_s27] sm:$0xff] (!%p290_p13)  ;;  %v338_v3 = vld [vmem:[%s298_s27 + $0x8] sm:$0xff] (!%p290_p13) }
  0x25   : > { %v339_v4 = vmul.f32 (!%p290_p13), %v337_v2, %v337_v2  ;;  %v340_v5 = vmul.f32 (!%p290_p13), %v338_v3, %v338_v3 }
  0x27   : > { %v342_v6 = vsel (!%p290_p13), %vm341_vm0, %v339_v4, 0.0  ;;  %v345_v7 = vsel (!%p290_p13), %vm341_vm0, %v340_v5, 0.0 }
  0x28   : > { %343 = vadd.xlane.f32.xlu0 (!%p290_p13), %v342_v6 }
  0x29   : > { %vm359_vm1 = vcmask (!%p712_p0), 254976   ;;  %v1010_v16 = vmov (!%p712_p0), 0.0  }
  0x2a   : > { %360 = vst.msk [vmem:[#allocation2] sm:$0x3] (!%p712_p0), %vm359_vm1, %v1010_v16 }
  0x2c   : > { %346 = vadd.xlane.f32.xlu0 %v345_v7 }
  0xb5   : > { %v344_v8 = vpop.xlane.xlu0 %343 }
  0xb6   : > { %v348_v9 = vmax.f32 %v344_v8, 1e-24 }
  0xb8   : > { %832 = vrsqrt.f32 %v348_v9 }
  0xb9   : > { %v347_v10 = vpop.xlane.xlu0 %346 }
  0xba   : > { %v349_v11 = vmax.f32 %v347_v10, 1e-24 }
  0xbc   : > { %834 = vrsqrt.f32 %v349_v11 }
  0xc2   : > { %v833_v12 = vpop.eup %832 }
  0xc3   : > { %v352_v13 = vmul.f32 %v833_v12, %v337_v2  ;;  %358 = sbr.rel (%p712_p0) target bundleno = 202 (0xca), region = 74 }
  0xc5   : > { %354 = vst.msk [vmem:[%s1132_s28] sm:$0xff] %vm341_vm0, %v352_v13 }
  0xc6   : > { %v835_v14 = vpop.eup %834 }
  0xc7   : > { %v353_v15 = vmul.f32 %v835_v14, %v338_v3 }
  0xc9   : > { %355 = vst.msk [vmem:[%s1132_s28 + $0x8] sm:$0xff] %vm341_vm0, %v353_v15 }
  0xca PF: > { %v362_v17 = vsel %vm341_vm0, %v352_v13, 0.0  ;;  %v369_v18 = vsel %vm341_vm0, %v353_v15, 0.0  ;;  %vm378_vm2 = vcmask 1041409   ;;  %v361_v29 = vld [vmem:[#allocation2] sm:$0x3]  ;;  %vm382_vm3 = vcmask 254976  }
  0xcb   : > { %v363_v19 = vrot.slane %v362_v17, 4  ;;  %v370_v20 = vrot.slane %v369_v18, 4  ;;  %p713_p1 = scmp.ne.s32.totalorder %s1000_s24, 1 }
  0xcc   : > { %v389_v34 = vld [vmem:[%s1291_s1] sm:$0xff] (!%p713_p1)  ;;  %v390_v35 = vld [vmem:[%s1291_s1 + $0x8] sm:$0xff] (!%p713_p1)  ;;  %v391_v36 = vld [vmem:[%s1291_s1 + $0x10] sm:$0xff] (!%p713_p1)  ;;  %v1011_v37 = vmov (!%p713_p1), 0.0|0.0   ;;  %vm1012_vm4 = vmmov (!%p713_p1), 0   ;;  %v1013_v40 = vmov (!%p713_p1), 0.0   ;;  %v482_v55 = vlaneseq (!%p713_p1) }
  0xcd   : > { %v364_v21 = vadd.f32 %v363_v19, %v362_v17  ;;  %v371_v22 = vadd.f32 %v370_v20, %v369_v18  ;;  %742 = vmatprep.subr.bf16.mxu0 (!%p713_p1), %v1011_v37  ;;  %v743_v38 = vpack.c.bf16 (!%p713_p1), %v390_v35, %v389_v34  ;;  %v392_v39 = vld [vmem:[%s1291_s1 + $0x18] sm:$0xff] (!%p713_p1)  ;;  %739 = vmatprep.mubr.msk.f32.mxu0 (!%p713_p1), %vm1012_vm4, %v1013_v40  ;;  %v481_v41 = vld [vmem:[%s1292_s2] sm:$0x3] (!%p713_p1)  ;;  %v1014_v42 = vmov (!%p713_p1), 0  }
  0xce   : > { %836 = vset.pattern.permute.xlu1 (!%p713_p1), %v1014_v42  ;;  %vm484_vm5 = vcmp.ne.s32.totalorder (!%p713_p1), %v481_v41, 4294967295  ;;  %837 = vset.pattern.permute.xlu0 (!%p713_p1), %v1014_v42  ;;  %v746_v43 = vpack.c.bf16 (!%p713_p1), %v392_v39, %v391_v36  ;;  %vm467_vm6 = vcmask (!%p713_p1), 123904   ;;  %v483_v57 = vand.u32 (!%p713_p1), 127, %v482_v55 }
  0xcf   : > { %v365_v23 = vrot.slane %v364_v21, 2  ;;  %v372_v24 = vrot.slane %v371_v22, 2  ;;  %744 = vmatpush3.bf16.msra.mxu0 (!%p713_p1), %v743_v38  ;;  %486 = vperm.xlu1 (!%p713_p1), %836, %v481_v41   ;;  %v489_v45 = vsel (!%p713_p1), %vm484_vm5, 1, %v1014_v42 }
  0xd0   : > { %745 = vmatprep.subr.bf16.mxu0 (!%p713_p1), %v1011_v37 }
  0xd1   : > { %v366_v25 = vadd.f32 %v365_v23, %v364_v21  ;;  %v373_v26 = vadd.f32 %v372_v24, %v371_v22 }
  0xd3   : > { %v367_v27 = vrot.slane %v366_v25, 1  ;;  %v374_v28 = vrot.slane %v373_v26, 1  ;;  %747 = vmatpush3.bf16.msra.mxu0 (!%p713_p1), %v746_v43  ;;  %491 = vperm.xlu1 (!%p713_p1), %836, %v489_v45  }
  0xd4   : > { %386 = sbr.rel (%p713_p1) target bundleno = 757 (0x2f5), region = 78 }
  0xd5   : > { %v368_v30 = vadd.f32 %v367_v27, %v366_v25  ;;  %v375_v31 = vadd.f32 %v374_v28, %v373_v26 }
  0xd7   : > { %v379_v32 = vsel %vm378_vm2, %v375_v31, %v368_v30 }
  0xd8   : > { %v381_v33 = vadd.f32 %v379_v32, %v361_v29 }
  0xda   : > { %383 = vst.msk [vmem:[#allocation2] sm:$0x3] %vm382_vm3, %v381_v33 }
  0xe1   : > { %v387_v44 = vld [vmem:[#allocation2] sm:$0x3] }
  0xe2   : > { %v388_v46 = vmul.f32 0.0625, %v387_v44 }
  0xe4   : > { %740 = vmatmul.mubr.msk.f32.vlgmr.msra.gmra.mrb[0].mxu0 %vm341_vm0, %v388_v46 }
 0x14e   : > { %v487_v54 = vpop.permute.xlu1 %486 }
 0x14f   : > { %vm488_vm9 = vcmp.eq.s32.totalorder %v483_v57, %v487_v54 }
 0x152   : > { %v492_v58 = vpop.permute.xlu1 %491 }
 0x153   : > { %vm493_vm10 = vcmp.eq.s32.totalorder %v492_v58, 1 }
 0x154   : > { %vm494_vm11 = vmand %vm493_vm10, %vm488_vm9 }
 0x1b7   : > { %v462_v47 = vpop.f32.mrb[0].mxu0 }
 0x1b8   : > { %v495_v48 = vmul.f32 %v462_v47, %v462_v47  ;;  %v741_v49 = vpop.f32.mrb[1].mxu0  ;;  %v466_v50 = vmul.f32 64.0, %v462_v47  ;;  %v505_v63 = vmul.f32 0.87758255, %v462_v47  ;;  %v715_v2 = vadd.f32 -0.23971277, %v462_v47 }
 0x1b9   : > { %vm508_vm12 = vcmp.gt.f32.partialorder %v462_v47, -0.87758255 }
 0x1ba   : > { %v496_v51 = vsub.f32 1.0, %v495_v48  ;;  %v469_v52 = vsel %vm467_vm6, %v466_v50, -inf  ;;  %468 = vst.msk [vmem:[#allocation8] sm:$0x3] %vm467_vm6, %v466_v50 }
 0x1bb   : > { %470 = vmax.xlane.f32.xlu0 %v469_v52 }
 0x1bc   : > { %v497_v53 = vmax.f32 %v496_v51, 0.0 }
 0x1be   : > { %838 = vrsqrt.f32 %v497_v53  ;;  %vm500_vm7 = vcmp.eq.f32.partialorder %v497_v53, inf  ;;  %v503_v60 = vand.u32 2147483648, %v497_v53  ;;  %vm502_vm8 = vcmp.eq.f32.partialorder %v497_v53, 0.0 }
 0x1c8   : > { %v839_v56 = vpop.eup %838 }
 0x1c9   : > { %v499_v59 = vmul.f32 %v839_v56, %v497_v53 }
 0x1cb   : > { %v501_v61 = vsel %vm500_vm7, %v497_v53, %v499_v59 }
 0x1cc   : > { %v504_v62 = vsel %vm502_vm8, %v503_v60, %v501_v61 }
 0x1cd   : > { %v506_v0 = vmul.f32 0.47942555, %v504_v62 }
 0x1cf   : > { %v507_v1 = vsub.f32 %v505_v63, %v506_v0 }
 0x1d1   : > { %v510_v3 = vsel %vm508_vm12, %v507_v1, %v715_v2 }
 0x1d2   : > { %v511_v4 = vsel %vm494_vm11, %v510_v3, %v462_v47 }
 0x1d3   : > { %v512_v5 = vmul.f32 64.0, %v511_v4 }
 0x1d5   : > { %513 = vst.msk [vmem:[#allocation6] sm:$0x3] %vm467_vm6, %v512_v5 }
 0x248   : > { %v471_v6 = vpop.xlane.xlu0 %470 }
 0x249   : > { %v472_v7 = vsub.f32 %v466_v50, %v471_v6 }
 0x24b   : > { %v473_v8 = vmul.f32 1.442695, %v472_v7 }
 0x24d   : > { %840 = vpow2.f32 %v473_v8 }
 0x257   : > { %v841_v9 = vpop.eup %840 }
 0x258   : > { %v475_v10 = vsel %vm467_vm6, %v841_v9, 0.0 }
 0x259   : > { %476 = vadd.xlane.f32.xlu0 %v475_v10 }
 0x2e6   : > { %v477_v11 = vpop.xlane.xlu0 %476 }
 0x2e7   : > { %842 = vrcp.f32 %v477_v11 }
 0x2f1   : > { %v843_v12 = vpop.eup %842 }
 0x2f2   : > { %v479_v13 = vmul.f32 %v843_v12, %v841_v9 }
 0x2f4   : > { %480 = vst.msk [vmem:[#allocation9] sm:$0x3] %vm467_vm6, %v479_v13 }
 0x2f5 PF: > { %s1015_s27 = smov [#allocation6]   ;;  %s717_s9 = sshll.u32 %s1000_s24, 7 }
 0x2f6   : > { %s546_s30 = sshll.u32 %s1015_s27, 4  ;;  %s547_s30 = int_to_ptr.vmem [resolvable:$true] %s546_s30 }
 0x2f7   : > { %s844_s12 = scalar_lea.vmem %s547_s30, 32  ;;  %p851_p7 = scmp.lt.s32.totalorder %s547_s30, %s547_s30 }
 0x2f8   : > { %p845_p2 = scmp.ne.s32.totalorder %s547_s30, %s844_s12  ;;  %p852_p8 = scmp.lt.s32.totalorder %s844_s12, %s844_s12 }
 0x2fa   : > { %p846_p4 = pnand %p845_p2, %p1094_p3  ;;  %p853_p11 = por %p852_p8, %p851_p7 }
 0x2fc   : > { %p847_p6 = pneg %p846_p4 }
 0x2fe   : > { %p854_p12 = pnand %p853_p11, %p847_p6 }
 0x300   : > { %857 = shalt.err (!%p854_p12)
}
 0x301   : > { %s858_s15 = scalar_lea.hbm %s1294_s4, 32 }
 0x302   : > { %p859_p13 = scmp.ne.s32.totalorder %s1294_s4, %s858_s15  ;;  %p864_p2 = scmp.lt.u32.totalorder %s858_s15, %s1294_s4 }
 0x304   : > { %p860_p0 = pnand %p859_p13, %p1094_p3 }
 0x306   : > { %p861_p1 = pneg %p860_p0 }
 0x308   : > { %p866_p4 = pnand %p864_p2, %p861_p1 }
 0x30a   : > { %869 = shalt.err (!%p866_p4)
}
 0x30b   : > { %750 = dma.vmem_to_hbm [thread:$0]  (%p1094_p3), %s547_s30, 32, %s1294_s4, [#allocation7]  }
 0x30c   : > { %s1185_s14 = scalar_lea.hbm %s1293_s3, %s717_s9  ;;  %s530_s16 = sshll.u32 %s1132_s28, 4  ;;  %s1188_s16 = int_to_ptr.vmem [resolvable:$true] %s530_s16 }
 0x30d   : > { %s1192_s15 = scalar_lea.sflag [#allocation5], %s296_s19  ;;  %s870_s17 = scalar_lea.vmem %s1188_s16, 256 }
 0x30e   : > { %p871_p6 = scmp.ne.s32.totalorder %s1188_s16, %s870_s17  ;;  %s1016_s30 = smov [#allocation4]  }
 0x30f   : > { %s874_s24 = sshll.u32 %s1016_s30, 4  ;;  %s875_s24 = int_to_ptr.vmem [resolvable:$false] %s874_s24 }
 0x310   : > { %p872_p7 = pnand %p871_p6, %p1102_p5  ;;  %s876_s18 = scalar_lea.vmem %s875_s24, 512 }
 0x311   : > { %p877_p11 = scmp.lt.s32.totalorder %s1188_s16, %s875_s24  ;;  %p878_p12 = scmp.lt.s32.totalorder %s876_s18, %s870_s17 }
 0x312   : > { %p873_p8 = pneg %p872_p7 }
 0x313   : > { %p879_p13 = por %p878_p12, %p877_p11 }
 0x315   : > { %p880_p0 = pnand %p879_p13, %p873_p8 }
 0x317   : > { %883 = shalt.err (!%p880_p0)
}
 0x318   : > { %s884_s19 = scalar_lea.hbm %s1185_s14, 256  ;;  %s888_s20 = scalar_lea.hbm %s1293_s3, 512 }
 0x319   : > { %p885_p1 = scmp.ne.s32.totalorder %s1185_s14, %s884_s19  ;;  %p889_p6 = scmp.lt.u32.totalorder %s1185_s14, %s1293_s3 }
 0x31a   : > { %p890_p7 = scmp.lt.u32.totalorder %s888_s20, %s884_s19  ;;  %p892_p11 = scmp.lt.u32.totalorder %s884_s19, %s1185_s14 }
 0x31b   : > { %p886_p2 = pnand %p885_p1, %p1102_p5 }
 0x31c   : > { %p891_p8 = por %p890_p7, %p889_p6 }
 0x31d   : > { %p887_p4 = pneg %p886_p2 }
 0x31e   : > { %p893_p12 = por %p892_p11, %p891_p8 }
 0x320   : > { %p894_p13 = pnand %p893_p12, %p887_p4 }
 0x322   : > { %897 = shalt.err (!%p894_p13)
}
 0x323   : > { %s1017_s13 = smov 128   ;;  %s1018_s17 = smov 256  }
 0x324   : > { %s1019_s30 = smov 8   ;;  %s1020_s24 = smov [#allocation8]  }
 0x325   : > { %748 = dma.vmem_to_hbm [thread:$0]  (%p1102_p5), %s1188_s16, 256, %s1185_s14, %s1192_s15, %s1017_s13, %s1018_s17, %s1019_s30  }
 0x326   : > { %s559_s18 = sshll.u32 %s1020_s24, 4  ;;  %s1021_s28 = smov [#allocation9]   ;;  %s560_s18 = int_to_ptr.vmem [resolvable:$true] %s559_s18 }
 0x327   : > { %s572_s9 = sshll.u32 %s1021_s28, 4  ;;  %s898_s19 = scalar_lea.vmem %s560_s18, 32  ;;  %s1216_s9 = int_to_ptr.vmem [resolvable:$true] %s572_s9 }
 0x328   : > { %p899_p0 = scmp.ne.s32.totalorder %s560_s18, %s898_s19  ;;  %p905_p4 = scmp.lt.s32.totalorder %s560_s18, %s560_s18 }
 0x329   : > { %p906_p6 = scmp.lt.s32.totalorder %s898_s19, %s898_s19 }
 0x32a   : > { %p900_p1 = pnand %p899_p0, %p1094_p3 }
 0x32b   : > { %p907_p7 = por %p906_p6, %p905_p4 }
 0x32c   : > { %p901_p2 = pneg %p900_p1 }
 0x32e   : > { %p908_p8 = pnand %p907_p7, %p901_p2 }
 0x330   : > { %911 = shalt.err (!%p908_p8)
}
 0x331   : > { %s912_s14 = scalar_lea.hbm %s1295_s5, 32 }
 0x332   : > { %p913_p5 = scmp.ne.s32.totalorder %s1295_s5, %s912_s14  ;;  %p918_p13 = scmp.lt.u32.totalorder %s912_s14, %s1295_s5 }
 0x334   : > { %p914_p11 = pnand %p913_p5, %p1094_p3 }
 0x336   : > { %p915_p12 = pneg %p914_p11 }
 0x338   : > { %p920_p0 = pnand %p918_p13, %p915_p12 }
 0x33a   : > { %923 = shalt.err (!%p920_p0)
}
 0x33b   : > { %752 = dma.vmem_to_hbm [thread:$0]  (%p1094_p3), %s560_s18, 32, %s1295_s5, [#allocation7]  }
 0x33c   : > { %s924_s30 = scalar_lea.vmem %s1216_s9, 32  ;;  %p931_p6 = scmp.lt.s32.totalorder %s1216_s9, %s1216_s9 }
 0x33d   : > { %p925_p1 = scmp.ne.s32.totalorder %s1216_s9, %s924_s30  ;;  %p932_p7 = scmp.lt.s32.totalorder %s924_s30, %s924_s30 }
 0x33f   : > { %p926_p2 = pnand %p925_p1, %p1094_p3  ;;  %p933_p8 = por %p932_p7, %p931_p6 }
 0x341   : > { %p927_p4 = pneg %p926_p2 }
 0x343   : > { %p934_p5 = pnand %p933_p8, %p927_p4 }
 0x345   : > { %937 = shalt.err (!%p934_p5)
}
 0x346   : > { %s938_s19 = scalar_lea.hbm %s1296_s6, 32 }
 0x347   : > { %p939_p11 = scmp.ne.s32.totalorder %s1296_s6, %s938_s19  ;;  %p944_p0 = scmp.lt.u32.totalorder %s938_s19, %s1296_s6 }
 0x349   : > { %p940_p12 = pnand %p939_p11, %p1094_p3 }
 0x34b   : > { %p941_p13 = pneg %p940_p12 }
 0x34d   : > { %p946_p1 = pnand %p944_p0, %p941_p13 }
 0x34f   : > { %949 = shalt.err (!%p946_p1)
}
 0x350   : > { %754 = dma.vmem_to_hbm [thread:$0]  (%p1094_p3), %s1216_s9, 32, %s1296_s6, [#allocation10]  }
 0x351   : > { %975 = dma.done.wait (%p1094_p3), [#allocation7], 64  }
 0x352   : > { %977 = vsyncadd (%p1094_p3), [#allocation7], 4294967232 }
 0x353   : > { %979 = dma.done.wait (%p1094_p3), [#allocation10], 32  }
 0x354   : > { %981 = vsyncadd (%p1094_p3), [#allocation10], 4294967264 }
 0x355 PF: > { %s596_s27 = sand.u32 1, %s988_s21   ;;  %p763_p2 = pnand %p706_p10, %p1113_p9 }
 0x356   : > { %s597_s9 = scalar_lea.sflag [#allocation5], %s596_s27 }
 0x357   : > { %983 = dma.done.wait (!%p763_p2), %s597_s9, 256  }
 0x358   : > { %985 = vsyncadd (!%p763_p2), %s597_s9, 4294967040  ;;  %s22_s26 = sadd.s32 1, %s1008_s26   ;;  %s1300_s21 = smov %s992_s22 }
 0x359   : > { %p19_p4 = scmp.ge.s32.totalorder %s22_s26, 4   ;;  %s1301_s22 = smov %s996_s23 }
 0x35a   : > { %s1302_s23 = smov %s1111_s10  ;;  %s1303_s24 = smov %s1004_s25 }
 0x35b   : > { %s1304_s25 = smov %s1306_s29  ;;  %21 = sbr.rel (!%p19_p4) target bundleno = 6 (0x6), region = 148 }
 0x362   :  { %602 = vsyncpa [#allocation5], 1 }
 0x363   :  { %604 = vsyncpa [#allocation5 + $0x1], 1 }
 0x364   :  { %605 = vsyncpa [#allocation7], 1 }
 0x365   :  { %606 = vsyncpa [#allocation10], 1 }

</bundles_post_ra>
